<compile_context>
chip_gen: v6e
topology: v6e:2x2x1
jax: 0.10.0
libtpu: 0.0.40
codegen_flags: <defaults>
</compile_context>

<pallas_src>
import functools

import jax
import jax.numpy as jnp
from jax.experimental import pallas as pl
from jax.experimental.pallas import tpu as pltpu

_MIB = 1024 * 1024


# ----------------------------------------------------------------------------
# Kernels
# ----------------------------------------------------------------------------
def _upsample_flat_kernel(x_ref, m_ref, o_ref):
    # x_ref: (bc, H*W)   m_ref: (H*W, sH*sW)   o_ref: (bc, sH*sW)
    # One lane-dense MXU matmul performs the full nearest-neighbor duplication.
    o_ref[...] = jnp.dot(
        x_ref[...], m_ref[...], preferred_element_type=jnp.float32
    ).astype(o_ref.dtype)


def _upsample_rows_kernel(x_ref, ew_ref, o_ref):
    # x_ref: (bc, H, W)   ew_ref: (W, s*W)   o_ref: (bc, H, s, s*W)
    # W-duplication via a single big matmul; H-duplication via replicated stores.
    bc, h, w = x_ref.shape
    s = o_ref.shape[2]
    sw = o_ref.shape[3]
    rows = jnp.dot(
        x_ref[...].reshape(bc * h, w), ew_ref[...],
        preferred_element_type=jnp.float32,
    ).reshape(bc, h, sw).astype(o_ref.dtype)
    for d in range(s):                      # s is tiny and static (e.g. 2)
        o_ref[:, :, d, :] = rows


# ----------------------------------------------------------------------------
# Sizing helpers
# ----------------------------------------------------------------------------
def _vmem_capacity_bytes():
    """Physical VMEM of the current chip; conservative fallback = v7x (64 MiB)."""
    try:
        return int(pltpu.get_tpu_info().vmem_capacity_bytes)
    except Exception:
        return 64 * _MIB


def _pick_bc(nc, per_row_bytes, resident_bytes, budget_bytes, align):
    """Planes per grid step: fill the VMEM budget, respect sublane alignment."""
    avail = max(budget_bytes - resident_bytes, per_row_bytes)
    bc = max(1, int(avail // per_row_bytes))
    if bc >= nc:
        return nc                            # single full-extent block (always legal)
    bc = (bc // align) * align
    return min(nc, max(align, bc))


# ----------------------------------------------------------------------------
# Wrapper: matches Upsample.forward (F.interpolate(x, scale_factor), NCHW)
# ----------------------------------------------------------------------------
def upsample_nearest(x, scale_factor=2):
    """x: (N, C, H, W) -> (N, C, s*H, s*W), nearest neighbor (PyTorch default mode)."""
    if float(scale_factor) != int(scale_factor) or int(scale_factor) < 1:
        # TODO(synk): fractional scale factors (out_i -> in[floor(i/scale)]) not implemented.
        raise NotImplementedError("only integer scale_factor is supported")
    s = int(scale_factor)
    if s == 1:
        return x
    if not jnp.issubdtype(x.dtype, jnp.floating):
        # TODO(synk): integer dtypes need a copy/store formulation (v7x MXU has no int path).
        raise NotImplementedError("only floating dtypes are supported")

    n, c, h, w = x.shape
    sh, sw = s * h, s * w
    nc = n * c
    itemsize = jnp.dtype(x.dtype).itemsize

    vmem_cap = _vmem_capacity_bytes()
    budget = vmem_cap // 3                   # ~21 MiB on v7x, ~42 MiB on v5e/v6e

    hw, shsw = h * w, sh * sw
    m_bytes = hw * shsw * itemsize           # combined one-hot selection matrix

    if m_bytes <= min(budget // 4, 8 * _MIB):
        # ---- Path A: lane-dense flat planes, single combined selection matmul.
        # out[p, i*sW + j] = x[p, (i//s)*W + (j//s)]
        src = ((jnp.arange(sh)[:, None] // s) * w
               + (jnp.arange(sw)[None, :] // s)).reshape(-1)          # (sH*sW,)
        m = (jnp.arange(hw)[:, None] == src[None, :]).astype(x.dtype)

        per_row = 2 * (hw + shsw) * itemsize + shsw * 4   # dbl-buffered io + f32 acc
        bc = _pick_bc(nc, per_row, 2 * m_bytes, budget, align=8)
        grid_n = pl.cdiv(nc, bc)

        need = bc * per_row + 2 * m_bytes + 2 * _MIB
        vmem_limit = int(min(vmem_cap * 7 // 8, max(need * 5 // 4, 16 * _MIB)))
        semantics = ("arbitrary",) if grid_n == 1 else ("parallel",)

        out = pl.pallas_call(
            _upsample_flat_kernel,
            out_shape=jax.ShapeDtypeStruct((nc, shsw), x.dtype),
            grid=(grid_n,),
            in_specs=[
                pl.BlockSpec((bc, hw), lambda i: (i, 0)),
                pl.BlockSpec((hw, shsw), lambda i: (0, 0)),   # resident in VMEM
            ],
            out_specs=pl.BlockSpec((bc, shsw), lambda i: (i, 0)),
            compiler_params=pltpu.CompilerParams(
                dimension_semantics=semantics,
                vmem_limit_bytes=vmem_limit,
            ),
            cost_estimate=pl.CostEstimate(
                flops=2 * nc * hw * shsw,
                transcendentals=0,
                bytes_accessed=(nc * hw + nc * shsw + hw * shsw) * itemsize),
        )(x.reshape(nc, hw), m)
        return out.reshape(n, c, sh, sw)

    # ---- Path B: large planes.  One (bc*H, W) @ (W, sW) matmul per grid step;
    # H-duplication is pure row replication into an (nc, H, s, sW) output whose
    # contiguous reshape to (nc, sH, sW) below is free.
    ew = (jnp.arange(w)[:, None] == (jnp.arange(sw)[None, :] // s)).astype(x.dtype)
    ew_bytes = w * sw * itemsize

    per_row = 2 * (h * w + h * s * sw) * itemsize + h * sw * 4
    bc = _pick_bc(nc, per_row, 2 * ew_bytes, budget, align=1)
    grid_n = pl.cdiv(nc, bc)

    need = bc * per_row + 2 * ew_bytes + 2 * _MIB
    vmem_limit = int(min(vmem_cap * 7 // 8, max(need * 5 // 4, 16 * _MIB)))
    semantics = ("arbitrary",) if grid_n == 1 else ("parallel",)

    out = pl.pallas_call(
        _upsample_rows_kernel,
        out_shape=jax.ShapeDtypeStruct((nc, h, s, sw), x.dtype),
        grid=(grid_n,),
        in_specs=[
            pl.BlockSpec((bc, h, w), lambda i: (i, 0, 0)),
            pl.BlockSpec((w, sw), lambda i: (0, 0)),          # resident in VMEM
        ],
        out_specs=pl.BlockSpec((bc, h, s, sw), lambda i: (i, 0, 0, 0)),
        compiler_params=pltpu.CompilerParams(
            dimension_semantics=semantics,
            vmem_limit_bytes=vmem_limit,
        ),
        cost_estimate=pl.CostEstimate(
            flops=2 * nc * h * w * sw,
            transcendentals=0,
            bytes_accessed=(nc * h * w + nc * h * s * sw + w * sw) * itemsize),
    )(x.reshape(nc, h, w), ew)
    return out.reshape(n, c, sh, sw)


if __name__ == "__main__":
    key = jax.random.PRNGKey(0)
    n, c, h, w = 2, 4, 16, 16  # NCHW, same as the PyTorch module's input
    x = jax.random.normal(key, (n, c, h, w), jnp.float32)

    up = jax.jit(functools.partial(upsample_nearest, scale_factor=2))
    y = up(x)
    jax.block_until_ready(y)

    # Reference: nearest 2x == repeat along H and W.
    expected = jnp.repeat(jnp.repeat(x, 2, axis=2), 2, axis=3)
    assert y.shape == (n, c, 2 * h, 2 * w), y.shape
    assert bool(jnp.all(jnp.isfinite(y)))
    assert bool(jnp.array_equal(y, expected)), "mismatch vs nearest-neighbor reference"
    print("KERNEL_OK")
</pallas_src>

<mosaic_0001>
module attributes {stable_mosaic.version = 11 : i64} {
  func.func @_upsample_flat_kernel(%arg0: i32, %arg1: memref<8x256xf32, #tpu.memory_space<vmem>>, %arg2: memref<256x1024xf32, #tpu.memory_space<vmem>>, %arg3: memref<8x1024xf32, #tpu.memory_space<vmem>>) attributes {dimension_semantics = [#tpu.dimension_semantics<arbitrary>], iteration_bounds = array<i64: 1>, scalar_prefetch = 0 : i64, scratch_operands = 0 : i64, tpu.core_type = #tpu.core_type<tc>, window_params = [{transform_indices = @transform_0, window_bounds = array<i64: 8, 256>}, {pipeline_mode = #tpu.pipeline_mode<synchronous>, transform_indices = @transform_1, window_bounds = array<i64: 256, 1024>}, {transform_indices = @transform_2, window_bounds = array<i64: 8, 1024>}]} {
    %c0 = arith.constant 0 : index
    %c0_0 = arith.constant 0 : index
    %0 = vector.load %arg1[%c0, %c0_0] : memref<8x256xf32, #tpu.memory_space<vmem>>, vector<8x256xf32>
    %c0_1 = arith.constant 0 : index
    %c0_2 = arith.constant 0 : index
    %1 = vector.load %arg2[%c0_1, %c0_2] : memref<256x1024xf32, #tpu.memory_space<vmem>>, vector<256x1024xf32>
    %cst = arith.constant dense<0.000000e+00> : vector<8x1024xf32>
    %2 = tpu.matmul %0, %1, %cst {dimension_numbers = #tpu.dot_dimension_numbers<[1], [0], [0], [1], [0, 0, 1, 1], [], []>} : vector<8x256xf32>, vector<256x1024xf32>, vector<8x1024xf32> -> vector<8x1024xf32>
    %c0_3 = arith.constant 0 : index
    %c0_4 = arith.constant 0 : index
    %3 = vector.load %arg3[%c0_3, %c0_4] : memref<8x1024xf32, #tpu.memory_space<vmem>>, vector<8x1024xf32>
    tpu.vector_store %arg3[%c0_3, %c0_4], %2 {strides = array<i32>} : memref<8x1024xf32, #tpu.memory_space<vmem>>, vector<8x1024xf32>,
    return
  }
  func.func @transform_0(%arg0: i32) -> (i32, i32) {
    %c0_i32 = arith.constant 0 : i32
    %c0_i32_0 = arith.constant 0 : i32
    return %arg0, %c0_i32 : i32, i32
  }
  func.func @transform_1(%arg0: i32) -> (i32, i32) {
    %c0_i32 = arith.constant 0 : i32
    %c0_i32_0 = arith.constant 0 : i32
    %c0_i32_1 = arith.constant 0 : i32
    return %c0_i32, %c0_i32_0 : i32, i32
  }
  func.func @transform_2(%arg0: i32) -> (i32, i32) {
    %c0_i32 = arith.constant 0 : i32
    %c0_i32_0 = arith.constant 0 : i32
    return %arg0, %c0_i32 : i32, i32
  }
}

</mosaic_0001>

<bundles_post_ra>
// kernel: upsample_nearest.1
= control target key start
LH: loop header
LB: loop body
LE: loop exit
PB: predicated region body
PF: predicated region fallthrough
CT: control target
= control target key end

     0   :  { %s1390_s1 = inlined_call_operand.vmem [shape: f32[256,1024], index: 1, kind: input, shape index: {}]   ;;  %s1391_s0 = inlined_call_operand.vmem [shape: f32[8,256], index: 0, kind: input, shape index: {}]   ;;  %s1392_s2 = inlined_call_operand.vmem [shape: f32[8,1024], index: 2, kind: output, shape index: {}]  }
   0x1   :  { %v134_v0 = vld [vmem:[%s1390_s1 + $0x3c8] sm:$0xff]  ;;  %v136_v1 = vld [vmem:[%s1390_s1 + $0x3d8] sm:$0xff]  ;;  %v133_v2 = vld [vmem:[%s1390_s1 + $0x3c0] sm:$0xff] }
   0x2   :  { %269 = vmatprep.subr.mxu0 %v134_v0  ;;  %340 = vmatprep.subr.mxu1 %v136_v1  ;;  %v135_v3 = vld [vmem:[%s1390_s1 + $0x3d0] sm:$0xff]  ;;  %v126_v4 = vld [vmem:[%s1390_s1 + $0x388] sm:$0xff]  ;;  %v128_v5 = vld [vmem:[%s1390_s1 + $0x398] sm:$0xff] }
   0x3   :  { %270 = vmatpush1.msra.mxu0 %v133_v2  ;;  %341 = vmatpush1.msra.mxu1 %v135_v3  ;;  %v125_v6 = vld [vmem:[%s1390_s1 + $0x380] sm:$0xff]  ;;  %v127_v7 = vld [vmem:[%s1390_s1 + $0x390] sm:$0xff]  ;;  %v118_v8 = vld [vmem:[%s1390_s1 + $0x348] sm:$0xff] }
   0x4   :  { %271 = vmatprep.subr.mxu0 %v126_v4  ;;  %342 = vmatprep.subr.mxu1 %v128_v5  ;;  %v120_v9 = vld [vmem:[%s1390_s1 + $0x358] sm:$0xff]  ;;  %v117_v10 = vld [vmem:[%s1390_s1 + $0x340] sm:$0xff]  ;;  %v119_v11 = vld [vmem:[%s1390_s1 + $0x350] sm:$0xff] }
   0x5   :  { %272 = vmatpush1.msra.mxu0 %v125_v6  ;;  %343 = vmatpush1.msra.mxu1 %v127_v7  ;;  %v110_v12 = vld [vmem:[%s1390_s1 + $0x308] sm:$0xff]  ;;  %v112_v13 = vld [vmem:[%s1390_s1 + $0x318] sm:$0xff]  ;;  %v109_v14 = vld [vmem:[%s1390_s1 + $0x300] sm:$0xff] }
   0x6   :  { %273 = vmatprep.subr.mxu0 %v118_v8  ;;  %344 = vmatprep.subr.mxu1 %v120_v9  ;;  %v111_v15 = vld [vmem:[%s1390_s1 + $0x310] sm:$0xff]  ;;  %v102_v16 = vld [vmem:[%s1390_s1 + $0x2c8] sm:$0xff]  ;;  %v104_v17 = vld [vmem:[%s1390_s1 + $0x2d8] sm:$0xff] }
   0x7   :  { %274 = vmatpush1.msra.mxu0 %v117_v10  ;;  %345 = vmatpush1.msra.mxu1 %v119_v11  ;;  %v101_v18 = vld [vmem:[%s1390_s1 + $0x2c0] sm:$0xff]  ;;  %v103_v19 = vld [vmem:[%s1390_s1 + $0x2d0] sm:$0xff]  ;;  %v94_v20 = vld [vmem:[%s1390_s1 + $0x288] sm:$0xff] }
   0x8   :  { %275 = vmatprep.subr.mxu0 %v110_v12  ;;  %346 = vmatprep.subr.mxu1 %v112_v13  ;;  %v96_v21 = vld [vmem:[%s1390_s1 + $0x298] sm:$0xff]  ;;  %v93_v22 = vld [vmem:[%s1390_s1 + $0x280] sm:$0xff]  ;;  %v95_v23 = vld [vmem:[%s1390_s1 + $0x290] sm:$0xff] }
   0x9   :  { %276 = vmatpush1.msra.mxu0 %v109_v14  ;;  %347 = vmatpush1.msra.mxu1 %v111_v15  ;;  %v86_v24 = vld [vmem:[%s1390_s1 + $0x248] sm:$0xff]  ;;  %v88_v25 = vld [vmem:[%s1390_s1 + $0x258] sm:$0xff]  ;;  %v85_v26 = vld [vmem:[%s1390_s1 + $0x240] sm:$0xff] }
   0xa   :  { %277 = vmatprep.subr.mxu0 %v102_v16  ;;  %348 = vmatprep.subr.mxu1 %v104_v17  ;;  %v87_v27 = vld [vmem:[%s1390_s1 + $0x250] sm:$0xff]  ;;  %v78_v28 = vld [vmem:[%s1390_s1 + $0x208] sm:$0xff]  ;;  %v80_v29 = vld [vmem:[%s1390_s1 + $0x218] sm:$0xff] }
   0xb   :  { %278 = vmatpush1.msra.mxu0 %v101_v18  ;;  %349 = vmatpush1.msra.mxu1 %v103_v19  ;;  %v77_v30 = vld [vmem:[%s1390_s1 + $0x200] sm:$0xff]  ;;  %v79_v31 = vld [vmem:[%s1390_s1 + $0x210] sm:$0xff]  ;;  %v70_v32 = vld [vmem:[%s1390_s1 + $0x1c8] sm:$0xff] }
   0xc   :  { %279 = vmatprep.subr.mxu0 %v94_v20  ;;  %350 = vmatprep.subr.mxu1 %v96_v21  ;;  %v72_v33 = vld [vmem:[%s1390_s1 + $0x1d8] sm:$0xff]  ;;  %v69_v34 = vld [vmem:[%s1390_s1 + $0x1c0] sm:$0xff]  ;;  %v71_v35 = vld [vmem:[%s1390_s1 + $0x1d0] sm:$0xff] }
   0xd   :  { %280 = vmatpush1.msra.mxu0 %v93_v22  ;;  %351 = vmatpush1.msra.mxu1 %v95_v23  ;;  %v62_v36 = vld [vmem:[%s1390_s1 + $0x188] sm:$0xff]  ;;  %v64_v37 = vld [vmem:[%s1390_s1 + $0x198] sm:$0xff]  ;;  %v61_v38 = vld [vmem:[%s1390_s1 + $0x180] sm:$0xff] }
   0xe   :  { %281 = vmatprep.subr.mxu0 %v86_v24  ;;  %352 = vmatprep.subr.mxu1 %v88_v25  ;;  %v63_v39 = vld [vmem:[%s1390_s1 + $0x190] sm:$0xff]  ;;  %v54_v40 = vld [vmem:[%s1390_s1 + $0x148] sm:$0xff]  ;;  %v56_v41 = vld [vmem:[%s1390_s1 + $0x158] sm:$0xff] }
   0xf   :  { %282 = vmatpush1.msra.mxu0 %v85_v26  ;;  %353 = vmatpush1.msra.mxu1 %v87_v27  ;;  %v53_v42 = vld [vmem:[%s1390_s1 + $0x140] sm:$0xff]  ;;  %v55_v43 = vld [vmem:[%s1390_s1 + $0x150] sm:$0xff]  ;;  %v46_v44 = vld [vmem:[%s1390_s1 + $0x108] sm:$0xff] }
  0x10   :  { %283 = vmatprep.subr.mxu0 %v78_v28  ;;  %354 = vmatprep.subr.mxu1 %v80_v29  ;;  %v48_v45 = vld [vmem:[%s1390_s1 + $0x118] sm:$0xff]  ;;  %v45_v46 = vld [vmem:[%s1390_s1 + $0x100] sm:$0xff]  ;;  %v47_v47 = vld [vmem:[%s1390_s1 + $0x110] sm:$0xff] }
  0x11   :  { %284 = vmatpush1.msra.mxu0 %v77_v30  ;;  %355 = vmatpush1.msra.mxu1 %v79_v31  ;;  %v38_v48 = vld [vmem:[%s1390_s1 + $0xc8] sm:$0xff]  ;;  %v40_v49 = vld [vmem:[%s1390_s1 + $0xd8] sm:$0xff]  ;;  %v37_v50 = vld [vmem:[%s1390_s1 + $0xc0] sm:$0xff] }
  0x12   :  { %285 = vmatprep.subr.mxu0 %v70_v32  ;;  %356 = vmatprep.subr.mxu1 %v72_v33  ;;  %v39_v51 = vld [vmem:[%s1390_s1 + $0xd0] sm:$0xff]  ;;  %v30_v52 = vld [vmem:[%s1390_s1 + $0x88] sm:$0xff]  ;;  %v32_v53 = vld [vmem:[%s1390_s1 + $0x98] sm:$0xff] }
  0x13   :  { %286 = vmatpush1.msra.mxu0 %v69_v34  ;;  %357 = vmatpush1.msra.mxu1 %v71_v35  ;;  %v29_v54 = vld [vmem:[%s1390_s1 + $0x80] sm:$0xff]  ;;  %v31_v55 = vld [vmem:[%s1390_s1 + $0x90] sm:$0xff]  ;;  %v22_v56 = vld [vmem:[%s1390_s1 + $0x48] sm:$0xff] }
  0x14   :  { %287 = vmatprep.subr.mxu0 %v62_v36  ;;  %358 = vmatprep.subr.mxu1 %v64_v37  ;;  %v24_v57 = vld [vmem:[%s1390_s1 + $0x58] sm:$0xff]  ;;  %v21_v58 = vld [vmem:[%s1390_s1 + $0x40] sm:$0xff]  ;;  %v23_v59 = vld [vmem:[%s1390_s1 + $0x50] sm:$0xff] }
  0x15   :  { %288 = vmatpush1.msra.mxu0 %v61_v38  ;;  %359 = vmatpush1.msra.mxu1 %v63_v39  ;;  %v14_v60 = vld [vmem:[%s1390_s1 + $0x8] sm:$0xff]  ;;  %v16_v61 = vld [vmem:[%s1390_s1 + $0x18] sm:$0xff]  ;;  %v13_v62 = vld [vmem:[%s1390_s1] sm:$0xff] }
  0x16   :  { %289 = vmatprep.subr.mxu0 %v54_v40  ;;  %360 = vmatprep.subr.mxu1 %v56_v41  ;;  %v15_v63 = vld [vmem:[%s1390_s1 + $0x10] sm:$0xff]  ;;  %v262_v0 = vld [vmem:[%s1390_s1 + $0x7c8] sm:$0xff]  ;;  %v264_v1 = vld [vmem:[%s1390_s1 + $0x7d8] sm:$0xff] }
  0x17   :  { %290 = vmatpush1.msra.mxu0 %v53_v42  ;;  %361 = vmatpush1.msra.mxu1 %v55_v43  ;;  %v261_v2 = vld [vmem:[%s1390_s1 + $0x7c0] sm:$0xff]  ;;  %v263_v3 = vld [vmem:[%s1390_s1 + $0x7d0] sm:$0xff]  ;;  %v254_v4 = vld [vmem:[%s1390_s1 + $0x788] sm:$0xff] }
  0x18   :  { %291 = vmatprep.subr.mxu0 %v46_v44  ;;  %362 = vmatprep.subr.mxu1 %v48_v45  ;;  %v256_v5 = vld [vmem:[%s1390_s1 + $0x798] sm:$0xff]  ;;  %v253_v6 = vld [vmem:[%s1390_s1 + $0x780] sm:$0xff]  ;;  %v255_v7 = vld [vmem:[%s1390_s1 + $0x790] sm:$0xff] }
  0x19   :  { %292 = vmatpush1.msra.mxu0 %v45_v46  ;;  %363 = vmatpush1.msra.mxu1 %v47_v47  ;;  %v246_v8 = vld [vmem:[%s1390_s1 + $0x748] sm:$0xff]  ;;  %v248_v9 = vld [vmem:[%s1390_s1 + $0x758] sm:$0xff]  ;;  %v245_v10 = vld [vmem:[%s1390_s1 + $0x740] sm:$0xff] }
  0x1a   :  { %293 = vmatprep.subr.mxu0 %v38_v48  ;;  %364 = vmatprep.subr.mxu1 %v40_v49  ;;  %v247_v11 = vld [vmem:[%s1390_s1 + $0x750] sm:$0xff]  ;;  %v238_v12 = vld [vmem:[%s1390_s1 + $0x708] sm:$0xff]  ;;  %v240_v13 = vld [vmem:[%s1390_s1 + $0x718] sm:$0xff] }
  0x1b   :  { %294 = vmatpush1.msra.mxu0 %v37_v50  ;;  %365 = vmatpush1.msra.mxu1 %v39_v51  ;;  %v237_v14 = vld [vmem:[%s1390_s1 + $0x700] sm:$0xff]  ;;  %v239_v15 = vld [vmem:[%s1390_s1 + $0x710] sm:$0xff]  ;;  %v230_v16 = vld [vmem:[%s1390_s1 + $0x6c8] sm:$0xff] }
  0x1c   :  { %295 = vmatprep.subr.mxu0 %v30_v52  ;;  %366 = vmatprep.subr.mxu1 %v32_v53  ;;  %v232_v17 = vld [vmem:[%s1390_s1 + $0x6d8] sm:$0xff]  ;;  %v229_v18 = vld [vmem:[%s1390_s1 + $0x6c0] sm:$0xff]  ;;  %v231_v19 = vld [vmem:[%s1390_s1 + $0x6d0] sm:$0xff] }
  0x1d   :  { %296 = vmatpush1.msra.mxu0 %v29_v54  ;;  %367 = vmatpush1.msra.mxu1 %v31_v55  ;;  %v222_v20 = vld [vmem:[%s1390_s1 + $0x688] sm:$0xff]  ;;  %v224_v21 = vld [vmem:[%s1390_s1 + $0x698] sm:$0xff]  ;;  %v221_v22 = vld [vmem:[%s1390_s1 + $0x680] sm:$0xff] }
  0x1e   :  { %297 = vmatprep.subr.mxu0 %v22_v56  ;;  %368 = vmatprep.subr.mxu1 %v24_v57  ;;  %v223_v23 = vld [vmem:[%s1390_s1 + $0x690] sm:$0xff]  ;;  %v214_v24 = vld [vmem:[%s1390_s1 + $0x648] sm:$0xff]  ;;  %v216_v25 = vld [vmem:[%s1390_s1 + $0x658] sm:$0xff] }
  0x1f   :  { %298 = vmatpush1.msra.mxu0 %v21_v58  ;;  %369 = vmatpush1.msra.mxu1 %v23_v59  ;;  %v213_v26 = vld [vmem:[%s1390_s1 + $0x640] sm:$0xff]  ;;  %v215_v27 = vld [vmem:[%s1390_s1 + $0x650] sm:$0xff]  ;;  %v206_v28 = vld [vmem:[%s1390_s1 + $0x608] sm:$0xff] }
  0x20   :  { %299 = vmatprep.subr.mxu0 %v14_v60  ;;  %370 = vmatprep.subr.mxu1 %v16_v61  ;;  %v208_v29 = vld [vmem:[%s1390_s1 + $0x618] sm:$0xff]  ;;  %v205_v30 = vld [vmem:[%s1390_s1 + $0x600] sm:$0xff]  ;;  %v207_v31 = vld [vmem:[%s1390_s1 + $0x610] sm:$0xff] }
  0x21   :  { %300 = vmatpush1.msra.mxu0 %v13_v62  ;;  %371 = vmatpush1.msra.mxu1 %v15_v63  ;;  %v198_v32 = vld [vmem:[%s1390_s1 + $0x5c8] sm:$0xff]  ;;  %v200_v33 = vld [vmem:[%s1390_s1 + $0x5d8] sm:$0xff]  ;;  %v197_v34 = vld [vmem:[%s1390_s1 + $0x5c0] sm:$0xff] }
  0x22   :  { %301 = vmatprep.subr.mxu0 %v262_v0  ;;  %372 = vmatprep.subr.mxu1 %v264_v1  ;;  %v199_v35 = vld [vmem:[%s1390_s1 + $0x5d0] sm:$0xff]  ;;  %v190_v36 = vld [vmem:[%s1390_s1 + $0x588] sm:$0xff]  ;;  %v192_v37 = vld [vmem:[%s1390_s1 + $0x598] sm:$0xff] }
  0x23   :  { %302 = vmatpush2.msra.mxu0 %v261_v2  ;;  %373 = vmatpush2.msra.mxu1 %v263_v3  ;;  %v189_v38 = vld [vmem:[%s1390_s1 + $0x580] sm:$0xff]  ;;  %v191_v39 = vld [vmem:[%s1390_s1 + $0x590] sm:$0xff]  ;;  %v182_v40 = vld [vmem:[%s1390_s1 + $0x548] sm:$0xff] }
  0x24   :  { %303 = vmatprep.subr.mxu0 %v254_v4  ;;  %374 = vmatprep.subr.mxu1 %v256_v5  ;;  %v184_v41 = vld [vmem:[%s1390_s1 + $0x558] sm:$0xff]  ;;  %v181_v42 = vld [vmem:[%s1390_s1 + $0x540] sm:$0xff]  ;;  %v183_v43 = vld [vmem:[%s1390_s1 + $0x550] sm:$0xff] }
  0x25   :  { %304 = vmatpush2.msra.mxu0 %v253_v6  ;;  %375 = vmatpush2.msra.mxu1 %v255_v7  ;;  %v174_v44 = vld [vmem:[%s1390_s1 + $0x508] sm:$0xff]  ;;  %v176_v45 = vld [vmem:[%s1390_s1 + $0x518] sm:$0xff]  ;;  %v173_v46 = vld [vmem:[%s1390_s1 + $0x500] sm:$0xff] }
  0x26   :  { %305 = vmatprep.subr.mxu0 %v246_v8  ;;  %376 = vmatprep.subr.mxu1 %v248_v9  ;;  %v175_v47 = vld [vmem:[%s1390_s1 + $0x510] sm:$0xff]  ;;  %v166_v48 = vld [vmem:[%s1390_s1 + $0x4c8] sm:$0xff]  ;;  %v168_v49 = vld [vmem:[%s1390_s1 + $0x4d8] sm:$0xff] }
  0x27   :  { %306 = vmatpush2.msra.mxu0 %v245_v10  ;;  %377 = vmatpush2.msra.mxu1 %v247_v11  ;;  %v165_v50 = vld [vmem:[%s1390_s1 + $0x4c0] sm:$0xff]  ;;  %v167_v51 = vld [vmem:[%s1390_s1 + $0x4d0] sm:$0xff]  ;;  %v158_v52 = vld [vmem:[%s1390_s1 + $0x488] sm:$0xff] }
  0x28   :  { %307 = vmatprep.subr.mxu0 %v238_v12  ;;  %378 = vmatprep.subr.mxu1 %v240_v13  ;;  %v160_v53 = vld [vmem:[%s1390_s1 + $0x498] sm:$0xff]  ;;  %v157_v54 = vld [vmem:[%s1390_s1 + $0x480] sm:$0xff]  ;;  %v159_v55 = vld [vmem:[%s1390_s1 + $0x490] sm:$0xff] }
  0x29   :  { %308 = vmatpush2.msra.mxu0 %v237_v14  ;;  %379 = vmatpush2.msra.mxu1 %v239_v15  ;;  %v150_v56 = vld [vmem:[%s1390_s1 + $0x448] sm:$0xff]  ;;  %v152_v57 = vld [vmem:[%s1390_s1 + $0x458] sm:$0xff]  ;;  %v149_v58 = vld [vmem:[%s1390_s1 + $0x440] sm:$0xff] }
  0x2a   :  { %309 = vmatprep.subr.mxu0 %v230_v16  ;;  %380 = vmatprep.subr.mxu1 %v232_v17  ;;  %v151_v59 = vld [vmem:[%s1390_s1 + $0x450] sm:$0xff]  ;;  %v142_v60 = vld [vmem:[%s1390_s1 + $0x408] sm:$0xff]  ;;  %v144_v61 = vld [vmem:[%s1390_s1 + $0x418] sm:$0xff] }
  0x2b   :  { %310 = vmatpush2.msra.mxu0 %v229_v18  ;;  %381 = vmatpush2.msra.mxu1 %v231_v19  ;;  %v141_v62 = vld [vmem:[%s1390_s1 + $0x400] sm:$0xff]  ;;  %v964_v63 = vld [vmem:[%s1391_s0 + $0x8] sm:$0xff]  ;;  %v143_v0 = vld [vmem:[%s1390_s1 + $0x410] sm:$0xff] }
  0x2c   :  { %311 = vmatprep.subr.mxu0 %v222_v20  ;;  %382 = vmatprep.subr.mxu1 %v224_v21  ;;  %v972_v1 = vld [vmem:[%s1391_s0] sm:$0xff]  ;;  %v138_v2 = vld [vmem:[%s1390_s1 + $0x3e8] sm:$0xff]  ;;  %v140_v3 = vld [vmem:[%s1390_s1 + $0x3f8] sm:$0xff] }
  0x2d   :  { %312 = vmatpush2.msra.mxu0 %v221_v22  ;;  %383 = vmatpush2.msra.mxu1 %v223_v23  ;;  %v137_v4 = vld [vmem:[%s1390_s1 + $0x3e0] sm:$0xff]  ;;  %v139_v5 = vld [vmem:[%s1390_s1 + $0x3f0] sm:$0xff]  ;;  %v130_v6 = vld [vmem:[%s1390_s1 + $0x3a8] sm:$0xff] }
  0x2e   :  { %313 = vmatprep.subr.mxu0 %v214_v24  ;;  %384 = vmatprep.subr.mxu1 %v216_v25  ;;  %v132_v7 = vld [vmem:[%s1390_s1 + $0x3b8] sm:$0xff]  ;;  %v129_v8 = vld [vmem:[%s1390_s1 + $0x3a0] sm:$0xff]  ;;  %v131_v9 = vld [vmem:[%s1390_s1 + $0x3b0] sm:$0xff] }
  0x2f   :  { %314 = vmatpush2.msra.mxu0 %v213_v26  ;;  %385 = vmatpush2.msra.mxu1 %v215_v27  ;;  %v122_v10 = vld [vmem:[%s1390_s1 + $0x368] sm:$0xff]  ;;  %v124_v11 = vld [vmem:[%s1390_s1 + $0x378] sm:$0xff]  ;;  %v121_v12 = vld [vmem:[%s1390_s1 + $0x360] sm:$0xff] }
  0x30   :  { %315 = vmatprep.subr.mxu0 %v206_v28  ;;  %386 = vmatprep.subr.mxu1 %v208_v29  ;;  %v123_v13 = vld [vmem:[%s1390_s1 + $0x370] sm:$0xff]  ;;  %v114_v14 = vld [vmem:[%s1390_s1 + $0x328] sm:$0xff]  ;;  %v116_v15 = vld [vmem:[%s1390_s1 + $0x338] sm:$0xff] }
  0x31   :  { %316 = vmatpush2.msra.mxu0 %v205_v30  ;;  %387 = vmatpush2.msra.mxu1 %v207_v31  ;;  %v113_v16 = vld [vmem:[%s1390_s1 + $0x320] sm:$0xff]  ;;  %v115_v17 = vld [vmem:[%s1390_s1 + $0x330] sm:$0xff]  ;;  %v106_v18 = vld [vmem:[%s1390_s1 + $0x2e8] sm:$0xff] }
  0x32   :  { %317 = vmatprep.subr.mxu0 %v198_v32  ;;  %388 = vmatprep.subr.mxu1 %v200_v33  ;;  %v108_v19 = vld [vmem:[%s1390_s1 + $0x2f8] sm:$0xff]  ;;  %v105_v20 = vld [vmem:[%s1390_s1 + $0x2e0] sm:$0xff]  ;;  %v107_v21 = vld [vmem:[%s1390_s1 + $0x2f0] sm:$0xff] }
  0x33   :  { %318 = vmatpush2.msra.mxu0 %v197_v34  ;;  %389 = vmatpush2.msra.mxu1 %v199_v35  ;;  %v98_v22 = vld [vmem:[%s1390_s1 + $0x2a8] sm:$0xff]  ;;  %v100_v23 = vld [vmem:[%s1390_s1 + $0x2b8] sm:$0xff]  ;;  %v97_v24 = vld [vmem:[%s1390_s1 + $0x2a0] sm:$0xff] }
  0x34   :  { %319 = vmatprep.subr.mxu0 %v190_v36  ;;  %390 = vmatprep.subr.mxu1 %v192_v37  ;;  %v99_v25 = vld [vmem:[%s1390_s1 + $0x2b0] sm:$0xff]  ;;  %v90_v26 = vld [vmem:[%s1390_s1 + $0x268] sm:$0xff]  ;;  %v92_v27 = vld [vmem:[%s1390_s1 + $0x278] sm:$0xff] }
  0x35   :  { %320 = vmatpush2.msra.mxu0 %v189_v38  ;;  %391 = vmatpush2.msra.mxu1 %v191_v39  ;;  %v89_v28 = vld [vmem:[%s1390_s1 + $0x260] sm:$0xff]  ;;  %v91_v29 = vld [vmem:[%s1390_s1 + $0x270] sm:$0xff]  ;;  %v82_v30 = vld [vmem:[%s1390_s1 + $0x228] sm:$0xff] }
  0x36   :  { %321 = vmatprep.subr.mxu0 %v182_v40  ;;  %392 = vmatprep.subr.mxu1 %v184_v41  ;;  %v84_v31 = vld [vmem:[%s1390_s1 + $0x238] sm:$0xff]  ;;  %v81_v32 = vld [vmem:[%s1390_s1 + $0x220] sm:$0xff]  ;;  %v83_v33 = vld [vmem:[%s1390_s1 + $0x230] sm:$0xff] }
  0x37   :  { %322 = vmatpush2.msra.mxu0 %v181_v42  ;;  %393 = vmatpush2.msra.mxu1 %v183_v43  ;;  %v74_v34 = vld [vmem:[%s1390_s1 + $0x1e8] sm:$0xff]  ;;  %v76_v35 = vld [vmem:[%s1390_s1 + $0x1f8] sm:$0xff]  ;;  %v73_v36 = vld [vmem:[%s1390_s1 + $0x1e0] sm:$0xff] }
  0x38   :  { %323 = vmatprep.subr.mxu0 %v174_v44  ;;  %394 = vmatprep.subr.mxu1 %v176_v45  ;;  %v75_v37 = vld [vmem:[%s1390_s1 + $0x1f0] sm:$0xff]  ;;  %v66_v38 = vld [vmem:[%s1390_s1 + $0x1a8] sm:$0xff]  ;;  %v68_v39 = vld [vmem:[%s1390_s1 + $0x1b8] sm:$0xff] }
  0x39   :  { %324 = vmatpush2.msra.mxu0 %v173_v46  ;;  %395 = vmatpush2.msra.mxu1 %v175_v47  ;;  %v65_v40 = vld [vmem:[%s1390_s1 + $0x1a0] sm:$0xff]  ;;  %v67_v41 = vld [vmem:[%s1390_s1 + $0x1b0] sm:$0xff]  ;;  %v58_v42 = vld [vmem:[%s1390_s1 + $0x168] sm:$0xff] }
  0x3a   :  { %325 = vmatprep.subr.mxu0 %v166_v48  ;;  %396 = vmatprep.subr.mxu1 %v168_v49  ;;  %v60_v43 = vld [vmem:[%s1390_s1 + $0x178] sm:$0xff]  ;;  %v57_v44 = vld [vmem:[%s1390_s1 + $0x160] sm:$0xff]  ;;  %v59_v45 = vld [vmem:[%s1390_s1 + $0x170] sm:$0xff] }
  0x3b   :  { %326 = vmatpush2.msra.mxu0 %v165_v50  ;;  %397 = vmatpush2.msra.mxu1 %v167_v51  ;;  %v50_v46 = vld [vmem:[%s1390_s1 + $0x128] sm:$0xff]  ;;  %v52_v47 = vld [vmem:[%s1390_s1 + $0x138] sm:$0xff]  ;;  %v49_v48 = vld [vmem:[%s1390_s1 + $0x120] sm:$0xff] }
  0x3c   :  { %327 = vmatprep.subr.mxu0 %v158_v52  ;;  %398 = vmatprep.subr.mxu1 %v160_v53  ;;  %v51_v49 = vld [vmem:[%s1390_s1 + $0x130] sm:$0xff]  ;;  %v42_v50 = vld [vmem:[%s1390_s1 + $0xe8] sm:$0xff]  ;;  %v44_v51 = vld [vmem:[%s1390_s1 + $0xf8] sm:$0xff] }
  0x3d   :  { %328 = vmatpush2.msra.mxu0 %v157_v54  ;;  %399 = vmatpush2.msra.mxu1 %v159_v55  ;;  %v41_v52 = vld [vmem:[%s1390_s1 + $0xe0] sm:$0xff]  ;;  %v43_v53 = vld [vmem:[%s1390_s1 + $0xf0] sm:$0xff]  ;;  %v34_v54 = vld [vmem:[%s1390_s1 + $0xa8] sm:$0xff] }
  0x3e   :  { %329 = vmatprep.subr.mxu0 %v150_v56  ;;  %400 = vmatprep.subr.mxu1 %v152_v57  ;;  %v36_v55 = vld [vmem:[%s1390_s1 + $0xb8] sm:$0xff]  ;;  %v33_v56 = vld [vmem:[%s1390_s1 + $0xa0] sm:$0xff]  ;;  %v35_v57 = vld [vmem:[%s1390_s1 + $0xb0] sm:$0xff] }
  0x3f   :  { %330 = vmatpush2.msra.mxu0 %v149_v58  ;;  %401 = vmatpush2.msra.mxu1 %v151_v59  ;;  %v26_v58 = vld [vmem:[%s1390_s1 + $0x68] sm:$0xff]  ;;  %v28_v59 = vld [vmem:[%s1390_s1 + $0x78] sm:$0xff] }
  0x40   :  { %331 = vmatprep.subr.mxu0 %v142_v60  ;;  %402 = vmatprep.subr.mxu1 %v144_v61  ;;  %v25_v60 = vld [vmem:[%s1390_s1 + $0x60] sm:$0xff]  ;;  %v27_v61 = vld [vmem:[%s1390_s1 + $0x70] sm:$0xff] }
  0x41   :  { %332 = vmatpush2.msra.mxu0 %v141_v62  ;;  %333 = vmatprep.mubr.f32.mxu0 %v964_v63  ;;  %v18_v62 = vld [vmem:[%s1390_s1 + $0x28] sm:$0xff] }
  0x42   :  { %403 = vmatpush2.msra.mxu1 %v143_v0  ;;  %404 = vmatprep.mubr.f32.mxu1 %v964_v63  ;;  %v20_v0 = vld [vmem:[%s1390_s1 + $0x38] sm:$0xff] }
  0x43   :  { %334 = vmatmul.mubr.f32.vlgmr.msra.gmra.mxu0 %v972_v1  ;;  %405 = vmatmul.mubr.f32.vlgmr.msra.gmra.mxu1 %v972_v1 }
  0x44   :  { %411 = vmatprep.subr.mxu0 %v138_v2  ;;  %482 = vmatprep.subr.mxu1 %v140_v3  ;;  %v17_v2 = vld [vmem:[%s1390_s1 + $0x20] sm:$0xff]  ;;  %v19_v3 = vld [vmem:[%s1390_s1 + $0x30] sm:$0xff] }
  0x45   :  { %412 = vmatpush1.msra.mxu0 %v137_v4  ;;  %483 = vmatpush1.msra.mxu1 %v139_v5  ;;  %v266_v4 = vld [vmem:[%s1390_s1 + $0x7e8] sm:$0xff]  ;;  %v268_v5 = vld [vmem:[%s1390_s1 + $0x7f8] sm:$0xff] }
  0x46   :  { %413 = vmatprep.subr.mxu0 %v130_v6  ;;  %484 = vmatprep.subr.mxu1 %v132_v7  ;;  %v265_v6 = vld [vmem:[%s1390_s1 + $0x7e0] sm:$0xff]  ;;  %v267_v7 = vld [vmem:[%s1390_s1 + $0x7f0] sm:$0xff] }
  0x47   :  { %414 = vmatpush1.msra.mxu0 %v129_v8  ;;  %485 = vmatpush1.msra.mxu1 %v131_v9  ;;  %v258_v8 = vld [vmem:[%s1390_s1 + $0x7a8] sm:$0xff]  ;;  %v260_v9 = vld [vmem:[%s1390_s1 + $0x7b8] sm:$0xff] }
  0x48   :  { %415 = vmatprep.subr.mxu0 %v122_v10  ;;  %486 = vmatprep.subr.mxu1 %v124_v11  ;;  %v257_v10 = vld [vmem:[%s1390_s1 + $0x7a0] sm:$0xff]  ;;  %v259_v11 = vld [vmem:[%s1390_s1 + $0x7b0] sm:$0xff] }
  0x49   :  { %416 = vmatpush1.msra.mxu0 %v121_v12  ;;  %487 = vmatpush1.msra.mxu1 %v123_v13  ;;  %v250_v12 = vld [vmem:[%s1390_s1 + $0x768] sm:$0xff]  ;;  %v252_v13 = vld [vmem:[%s1390_s1 + $0x778] sm:$0xff] }
  0x4a   :  { %417 = vmatprep.subr.mxu0 %v114_v14  ;;  %488 = vmatprep.subr.mxu1 %v116_v15  ;;  %v249_v14 = vld [vmem:[%s1390_s1 + $0x760] sm:$0xff]  ;;  %v251_v15 = vld [vmem:[%s1390_s1 + $0x770] sm:$0xff] }
  0x4b   :  { %418 = vmatpush1.msra.mxu0 %v113_v16  ;;  %489 = vmatpush1.msra.mxu1 %v115_v17  ;;  %v242_v16 = vld [vmem:[%s1390_s1 + $0x728] sm:$0xff]  ;;  %v244_v17 = vld [vmem:[%s1390_s1 + $0x738] sm:$0xff] }
  0x4c   :  { %419 = vmatprep.subr.mxu0 %v106_v18  ;;  %490 = vmatprep.subr.mxu1 %v108_v19  ;;  %v241_v18 = vld [vmem:[%s1390_s1 + $0x720] sm:$0xff]  ;;  %v243_v19 = vld [vmem:[%s1390_s1 + $0x730] sm:$0xff] }
  0x4d   :  { %420 = vmatpush1.msra.mxu0 %v105_v20  ;;  %491 = vmatpush1.msra.mxu1 %v107_v21  ;;  %v234_v20 = vld [vmem:[%s1390_s1 + $0x6e8] sm:$0xff]  ;;  %v236_v21 = vld [vmem:[%s1390_s1 + $0x6f8] sm:$0xff] }
  0x4e   :  { %421 = vmatprep.subr.mxu0 %v98_v22  ;;  %492 = vmatprep.subr.mxu1 %v100_v23  ;;  %v233_v22 = vld [vmem:[%s1390_s1 + $0x6e0] sm:$0xff]  ;;  %v235_v23 = vld [vmem:[%s1390_s1 + $0x6f0] sm:$0xff] }
  0x4f   :  { %422 = vmatpush1.msra.mxu0 %v97_v24  ;;  %493 = vmatpush1.msra.mxu1 %v99_v25  ;;  %v226_v24 = vld [vmem:[%s1390_s1 + $0x6a8] sm:$0xff]  ;;  %v228_v25 = vld [vmem:[%s1390_s1 + $0x6b8] sm:$0xff] }
  0x50   :  { %423 = vmatprep.subr.mxu0 %v90_v26  ;;  %494 = vmatprep.subr.mxu1 %v92_v27  ;;  %v225_v26 = vld [vmem:[%s1390_s1 + $0x6a0] sm:$0xff]  ;;  %v227_v27 = vld [vmem:[%s1390_s1 + $0x6b0] sm:$0xff] }
  0x51   :  { %424 = vmatpush1.msra.mxu0 %v89_v28  ;;  %495 = vmatpush1.msra.mxu1 %v91_v29  ;;  %v218_v28 = vld [vmem:[%s1390_s1 + $0x668] sm:$0xff]  ;;  %v220_v29 = vld [vmem:[%s1390_s1 + $0x678] sm:$0xff] }
  0x52   :  { %425 = vmatprep.subr.mxu0 %v82_v30  ;;  %496 = vmatprep.subr.mxu1 %v84_v31  ;;  %v217_v30 = vld [vmem:[%s1390_s1 + $0x660] sm:$0xff]  ;;  %v219_v31 = vld [vmem:[%s1390_s1 + $0x670] sm:$0xff] }
  0x53   :  { %426 = vmatpush1.msra.mxu0 %v81_v32  ;;  %497 = vmatpush1.msra.mxu1 %v83_v33  ;;  %v210_v32 = vld [vmem:[%s1390_s1 + $0x628] sm:$0xff]  ;;  %v212_v33 = vld [vmem:[%s1390_s1 + $0x638] sm:$0xff] }
  0x54   :  { %427 = vmatprep.subr.mxu0 %v74_v34  ;;  %498 = vmatprep.subr.mxu1 %v76_v35  ;;  %v209_v34 = vld [vmem:[%s1390_s1 + $0x620] sm:$0xff]  ;;  %v211_v35 = vld [vmem:[%s1390_s1 + $0x630] sm:$0xff] }
  0x55   :  { %428 = vmatpush1.msra.mxu0 %v73_v36  ;;  %499 = vmatpush1.msra.mxu1 %v75_v37  ;;  %v202_v36 = vld [vmem:[%s1390_s1 + $0x5e8] sm:$0xff]  ;;  %v204_v37 = vld [vmem:[%s1390_s1 + $0x5f8] sm:$0xff] }
  0x56   :  { %429 = vmatprep.subr.mxu0 %v66_v38  ;;  %500 = vmatprep.subr.mxu1 %v68_v39  ;;  %v201_v38 = vld [vmem:[%s1390_s1 + $0x5e0] sm:$0xff]  ;;  %v203_v39 = vld [vmem:[%s1390_s1 + $0x5f0] sm:$0xff] }
  0x57   :  { %430 = vmatpush1.msra.mxu0 %v65_v40  ;;  %501 = vmatpush1.msra.mxu1 %v67_v41  ;;  %v194_v40 = vld [vmem:[%s1390_s1 + $0x5a8] sm:$0xff]  ;;  %v196_v41 = vld [vmem:[%s1390_s1 + $0x5b8] sm:$0xff] }
  0x58   :  { %431 = vmatprep.subr.mxu0 %v58_v42  ;;  %502 = vmatprep.subr.mxu1 %v60_v43  ;;  %v193_v42 = vld [vmem:[%s1390_s1 + $0x5a0] sm:$0xff]  ;;  %v195_v43 = vld [vmem:[%s1390_s1 + $0x5b0] sm:$0xff] }
  0x59   :  { %432 = vmatpush1.msra.mxu0 %v57_v44  ;;  %503 = vmatpush1.msra.mxu1 %v59_v45  ;;  %v186_v44 = vld [vmem:[%s1390_s1 + $0x568] sm:$0xff]  ;;  %v188_v45 = vld [vmem:[%s1390_s1 + $0x578] sm:$0xff] }
  0x5a   :  { %433 = vmatprep.subr.mxu0 %v50_v46  ;;  %504 = vmatprep.subr.mxu1 %v52_v47  ;;  %v185_v46 = vld [vmem:[%s1390_s1 + $0x560] sm:$0xff]  ;;  %v187_v47 = vld [vmem:[%s1390_s1 + $0x570] sm:$0xff] }
  0x5b   :  { %434 = vmatpush1.msra.mxu0 %v49_v48  ;;  %505 = vmatpush1.msra.mxu1 %v51_v49  ;;  %v178_v48 = vld [vmem:[%s1390_s1 + $0x528] sm:$0xff]  ;;  %v180_v49 = vld [vmem:[%s1390_s1 + $0x538] sm:$0xff] }
  0x5c   :  { %435 = vmatprep.subr.mxu0 %v42_v50  ;;  %506 = vmatprep.subr.mxu1 %v44_v51  ;;  %v177_v50 = vld [vmem:[%s1390_s1 + $0x520] sm:$0xff]  ;;  %v179_v51 = vld [vmem:[%s1390_s1 + $0x530] sm:$0xff] }
  0x5d   :  { %436 = vmatpush1.msra.mxu0 %v41_v52  ;;  %507 = vmatpush1.msra.mxu1 %v43_v53  ;;  %v170_v52 = vld [vmem:[%s1390_s1 + $0x4e8] sm:$0xff]  ;;  %v172_v53 = vld [vmem:[%s1390_s1 + $0x4f8] sm:$0xff] }
  0x5e   :  { %437 = vmatprep.subr.mxu0 %v34_v54  ;;  %508 = vmatprep.subr.mxu1 %v36_v55  ;;  %v169_v54 = vld [vmem:[%s1390_s1 + $0x4e0] sm:$0xff]  ;;  %v171_v55 = vld [vmem:[%s1390_s1 + $0x4f0] sm:$0xff] }
  0x5f   :  { %438 = vmatpush1.msra.mxu0 %v33_v56  ;;  %509 = vmatpush1.msra.mxu1 %v35_v57  ;;  %v162_v56 = vld [vmem:[%s1390_s1 + $0x4a8] sm:$0xff]  ;;  %v164_v57 = vld [vmem:[%s1390_s1 + $0x4b8] sm:$0xff] }
  0x60   :  { %439 = vmatprep.subr.mxu0 %v26_v58  ;;  %510 = vmatprep.subr.mxu1 %v28_v59  ;;  %v161_v58 = vld [vmem:[%s1390_s1 + $0x4a0] sm:$0xff]  ;;  %v163_v59 = vld [vmem:[%s1390_s1 + $0x4b0] sm:$0xff] }
  0x61   :  { %440 = vmatpush1.msra.mxu0 %v25_v60  ;;  %511 = vmatpush1.msra.mxu1 %v27_v61  ;;  %v154_v60 = vld [vmem:[%s1390_s1 + $0x468] sm:$0xff]  ;;  %v156_v61 = vld [vmem:[%s1390_s1 + $0x478] sm:$0xff] }
  0x62   :  { %441 = vmatprep.subr.mxu0 %v18_v62  ;;  %512 = vmatprep.subr.mxu1 %v20_v0  ;;  %v153_v62 = vld [vmem:[%s1390_s1 + $0x460] sm:$0xff]  ;;  %v155_v0 = vld [vmem:[%s1390_s1 + $0x470] sm:$0xff] }
  0x63   :  { %442 = vmatpush1.msra.mxu0 %v17_v2  ;;  %513 = vmatpush1.msra.mxu1 %v19_v3  ;;  %v146_v2 = vld [vmem:[%s1390_s1 + $0x428] sm:$0xff]  ;;  %v148_v3 = vld [vmem:[%s1390_s1 + $0x438] sm:$0xff] }
  0x64   :  { %443 = vmatprep.subr.mxu0 %v266_v4  ;;  %514 = vmatprep.subr.mxu1 %v268_v5  ;;  %v145_v4 = vld [vmem:[%s1390_s1 + $0x420] sm:$0xff]  ;;  %v147_v5 = vld [vmem:[%s1390_s1 + $0x430] sm:$0xff] }
  0x65   :  { %444 = vmatpush2.msra.mxu0 %v265_v6  ;;  %515 = vmatpush2.msra.mxu1 %v267_v7 }
  0x66   :  { %445 = vmatprep.subr.mxu0 %v258_v8  ;;  %516 = vmatprep.subr.mxu1 %v260_v9 }
  0x67   :  { %446 = vmatpush2.msra.mxu0 %v257_v10  ;;  %517 = vmatpush2.msra.mxu1 %v259_v11 }
  0x68   :  { %447 = vmatprep.subr.mxu0 %v250_v12  ;;  %518 = vmatprep.subr.mxu1 %v252_v13 }
  0x69   :  { %448 = vmatpush2.msra.mxu0 %v249_v14  ;;  %519 = vmatpush2.msra.mxu1 %v251_v15 }
  0x6a   :  { %449 = vmatprep.subr.mxu0 %v242_v16  ;;  %520 = vmatprep.subr.mxu1 %v244_v17 }
  0x6b   :  { %450 = vmatpush2.msra.mxu0 %v241_v18  ;;  %521 = vmatpush2.msra.mxu1 %v243_v19 }
  0x6c   :  { %451 = vmatprep.subr.mxu0 %v234_v20  ;;  %522 = vmatprep.subr.mxu1 %v236_v21 }
  0x6d   :  { %452 = vmatpush2.msra.mxu0 %v233_v22  ;;  %523 = vmatpush2.msra.mxu1 %v235_v23 }
  0x6e   :  { %453 = vmatprep.subr.mxu0 %v226_v24  ;;  %524 = vmatprep.subr.mxu1 %v228_v25 }
  0x6f   :  { %454 = vmatpush2.msra.mxu0 %v225_v26  ;;  %525 = vmatpush2.msra.mxu1 %v227_v27 }
  0x70   :  { %455 = vmatprep.subr.mxu0 %v218_v28  ;;  %526 = vmatprep.subr.mxu1 %v220_v29 }
  0x71   :  { %456 = vmatpush2.msra.mxu0 %v217_v30  ;;  %527 = vmatpush2.msra.mxu1 %v219_v31 }
  0x72   :  { %457 = vmatprep.subr.mxu0 %v210_v32  ;;  %528 = vmatprep.subr.mxu1 %v212_v33 }
  0x73   :  { %458 = vmatpush2.msra.mxu0 %v209_v34  ;;  %529 = vmatpush2.msra.mxu1 %v211_v35 }
  0x74   :  { %459 = vmatprep.subr.mxu0 %v202_v36  ;;  %530 = vmatprep.subr.mxu1 %v204_v37 }
  0x75   :  { %460 = vmatpush2.msra.mxu0 %v201_v38  ;;  %531 = vmatpush2.msra.mxu1 %v203_v39 }
  0x76   :  { %461 = vmatprep.subr.mxu0 %v194_v40  ;;  %532 = vmatprep.subr.mxu1 %v196_v41 }
  0x77   :  { %462 = vmatpush2.msra.mxu0 %v193_v42  ;;  %533 = vmatpush2.msra.mxu1 %v195_v43 }
  0x78   :  { %463 = vmatprep.subr.mxu0 %v186_v44  ;;  %534 = vmatprep.subr.mxu1 %v188_v45 }
  0x79   :  { %464 = vmatpush2.msra.mxu0 %v185_v46  ;;  %535 = vmatpush2.msra.mxu1 %v187_v47 }
  0x7a   :  { %465 = vmatprep.subr.mxu0 %v178_v48  ;;  %536 = vmatprep.subr.mxu1 %v180_v49 }
  0x7b   :  { %466 = vmatpush2.msra.mxu0 %v177_v50  ;;  %537 = vmatpush2.msra.mxu1 %v179_v51 }
  0x7c   :  { %467 = vmatprep.subr.mxu0 %v170_v52  ;;  %538 = vmatprep.subr.mxu1 %v172_v53 }
  0x7d   :  { %468 = vmatpush2.msra.mxu0 %v169_v54  ;;  %539 = vmatpush2.msra.mxu1 %v171_v55 }
  0x7e   :  { %469 = vmatprep.subr.mxu0 %v162_v56  ;;  %540 = vmatprep.subr.mxu1 %v164_v57 }
  0x7f   :  { %470 = vmatpush2.msra.mxu0 %v161_v58  ;;  %541 = vmatpush2.msra.mxu1 %v163_v59 }
  0x80   :  { %471 = vmatprep.subr.mxu0 %v154_v60  ;;  %542 = vmatprep.subr.mxu1 %v156_v61 }
  0x81   :  { %472 = vmatpush2.msra.mxu0 %v153_v62  ;;  %543 = vmatpush2.msra.mxu1 %v155_v0 }
  0x82   :  { %473 = vmatprep.subr.mxu0 %v146_v2  ;;  %544 = vmatprep.subr.mxu1 %v148_v3 }
  0x83   :  { %474 = vmatpush2.msra.mxu0 %v145_v4  ;;  %475 = vmatprep.mubr.f32.mxu0 %v964_v63 }
  0x84   :  { %545 = vmatpush2.msra.mxu1 %v147_v5  ;;  %546 = vmatprep.mubr.f32.mxu1 %v964_v63 }
  0x85   :  { %476 = vmatmul.mubr.f32.vlgmr.msra.gmra.mxu0 %v972_v1  ;;  %547 = vmatmul.mubr.f32.vlgmr.msra.gmra.mxu1 %v972_v1 }
 0x103   :  { %v335_v6 = vpop.f32.mrf.mxu0  ;;  %v406_v7 = vpop.f32.mrf.mxu1 }
 0x104   :  { %553 = vst [vmem:[%s1392_s2] sm:$0xff] %v335_v6  ;;  %555 = vst [vmem:[%s1392_s2 + $0x10] sm:$0xff] %v406_v7 }
 0x105   :  { %v337_v8 = vpop.f32.mrf.mxu0  ;;  %v408_v9 = vpop.f32.mrf.mxu1 }
 0x106   :  { %554 = vst [vmem:[%s1392_s2 + $0x8] sm:$0xff] %v337_v8  ;;  %556 = vst [vmem:[%s1392_s2 + $0x18] sm:$0xff] %v408_v9 }
 0x145   :  { %v477_v63 = vpop.f32.mrf.mxu0  ;;  %v548_v1 = vpop.f32.mrf.mxu1 }
 0x146   :  { %557 = vst [vmem:[%s1392_s2 + $0x20] sm:$0xff] %v477_v63  ;;  %559 = vst [vmem:[%s1392_s2 + $0x30] sm:$0xff] %v548_v1 }
 0x147   :  { %v479_v10 = vpop.f32.mrf.mxu0  ;;  %v550_v11 = vpop.f32.mrf.mxu1 }
 0x148   :  { %558 = vst [vmem:[%s1392_s2 + $0x28] sm:$0xff] %v479_v10  ;;  %560 = vst [vmem:[%s1392_s2 + $0x38] sm:$0xff] %v550_v11 }

</bundles_post_ra>
